<compile_context>
chip_gen: v5e
topology: v5e:2x2
jax: 0.10.0
libtpu: 0.0.40
codegen_flags: <defaults>
</compile_context>

<pallas_src>
import functools

import jax
import jax.numpy as jnp
from jax.experimental import pallas as pl
from jax.experimental.pallas import tpu as pltpu

LANE = 128
SUBLANE = 8


def _round_up(n: int, m: int) -> int:
    return ((n + m - 1) // m) * m


def _fused_mlp_kernel(x_ref, w_ref, b_ref, o_ref, *, num_layers: int, pad_width: int):
    """(Linear+ReLU)*(n-1) -> Linear+Sigmoid, entirely in VMEM.

    x_ref: [TILE_B, P]  (features zero-padded to P)
    w_ref: [P, num_layers*P]  packed weight slab, layer i at lanes [i*P, (i+1)*P)
    b_ref: [1, num_layers*P]  packed bias slab
    o_ref: [TILE_B, P]  lane-dense output; true outputs live in the first lanes
    """
    h = x_ref[...]
    for i in range(num_layers):
        w = w_ref[:, i * pad_width:(i + 1) * pad_width]      # static slice, lane-aligned
        b = b_ref[:, i * pad_width:(i + 1) * pad_width]      # [1, P] broadcasts over rows
        y = jnp.dot(h, w, preferred_element_type=jnp.float32) + b
        if i < num_layers - 1:
            h = jnp.maximum(y, 0.0)        # VPU; padded lanes stay exactly 0
        else:
            h = jax.nn.sigmoid(y)          # EUP exp + reciprocal
    o_ref[...] = h.astype(o_ref.dtype)


def prepare_params(params, in_features: int):
    """One-time packing: pad every layer to a uniform [P, P] tile (P = lane-
    rounded max width) and concatenate along the lane axis into single slabs.
    Zero rows/cols guarantee padded lanes contribute nothing through ReLU."""
    num_layers = len(params)
    dims = [in_features] + [w.shape[1] for (w, _) in params]
    pad_width = max(_round_up(d, LANE) for d in dims)

    w_cols, b_cols = [], []
    for (w, b) in params:
        fin, fout = w.shape
        w_p = jnp.zeros((pad_width, pad_width), jnp.float32).at[:fin, :fout].set(w)
        b_p = jnp.zeros((1, pad_width), jnp.float32).at[0, :fout].set(b)
        w_cols.append(w_p)
        b_cols.append(b_p)

    return dict(
        w_slab=jnp.concatenate(w_cols, axis=1),    # [P, L*P]
        b_slab=jnp.concatenate(b_cols, axis=1),    # [1, L*P]
        pad_width=pad_width,
        num_layers=num_layers,
        in_features=in_features,
        out_features=params[-1][0].shape[1],
    )


def net_forward(w_slab, b_slab, x, *, num_layers, pad_width, in_features,
                out_features, tile_b=None):
    """Fused forward pass. x: [B, in_features] (stack MC samples / examples
    along B to amortize launch cost — the batch grid is marked parallel)."""
    B = x.shape[0]
    if tile_b is None:
        # small batches: one grid step; large batches: 256-row tiles (fills
        # the 256-wide MXU on v6e/v7x; multiple-of-128 also fine for v5e).
        tile_b = 256 if B >= 256 else _round_up(max(B, 1), SUBLANE)
    b_pad = _round_up(B, tile_b)

    # Only per-call prep: zero-pad features -> P and rows -> tile multiple.
    x_p = jnp.zeros((b_pad, pad_width), jnp.float32).at[:B, :in_features].set(
        x.astype(jnp.float32))

    kernel = functools.partial(_fused_mlp_kernel, num_layers=num_layers,
                               pad_width=pad_width)
    out = pl.pallas_call(
        kernel,
        out_shape=jax.ShapeDtypeStruct((b_pad, pad_width), jnp.float32),
        grid=(b_pad // tile_b,),
        in_specs=[
            pl.BlockSpec((tile_b, pad_width), lambda i: (i, 0)),
            pl.BlockSpec((pad_width, num_layers * pad_width), lambda i: (0, 0)),
            pl.BlockSpec((1, num_layers * pad_width), lambda i: (0, 0)),
        ],
        out_specs=pl.BlockSpec((tile_b, pad_width), lambda i: (i, 0)),
        compiler_params=pltpu.CompilerParams(dimension_semantics=("parallel",)),
    )(x_p, w_slab, b_slab)

    # padded output lanes hold sigmoid(0)=0.5 -> slice them (and padded rows) off
    return out[:B, :out_features]


def init_net_params(layer_sizes, in_features=51, seed=0):
    """Deterministic init matching nn.Linear's U(-1/sqrt(fan_in), +1/sqrt(fan_in)).
    Weights stored as [in, out] (transpose of PyTorch) for the x @ W convention."""
    key = jax.random.PRNGKey(seed)
    params = []
    fan_in = in_features
    for fan_out in layer_sizes:
        key, kw, kb = jax.random.split(key, 3)
        bound = 1.0 / jnp.sqrt(jnp.float32(fan_in))
        w = jax.random.uniform(kw, (fan_in, fan_out), jnp.float32, -bound, bound)
        b = jax.random.uniform(kb, (fan_out,), jnp.float32, -bound, bound)
        params.append((w, b))
        fan_in = fan_out
    return params


def _reference(params, x):
    h = x
    for w, b in params[:-1]:
        h = jnp.maximum(h @ w + b, 0.0)
    w, b = params[-1]
    return jax.nn.sigmoid(h @ w + b)


if __name__ == "__main__":
    layer_sizes = [32, 16, 1]   # hidden sizes; final layer -> 1 output
    in_features = 51

    params = init_net_params(layer_sizes, in_features=in_features, seed=0)
    prep = prepare_params(params, in_features=in_features)   # one-time packing

    static = dict(num_layers=prep["num_layers"], pad_width=prep["pad_width"],
                  in_features=prep["in_features"], out_features=prep["out_features"])

    key = jax.random.PRNGKey(0)

    # --- small single-evaluation batch (grid = 1) ---
    x = jax.random.normal(key, (8, in_features), jnp.float32)
    fwd = jax.jit(functools.partial(net_forward, **static))
    out = jax.block_until_ready(fwd(prep["w_slab"], prep["b_slab"], x))
    assert out.shape == (8, layer_sizes[-1]), out.shape
    assert bool(jnp.all((out >= 0.0) & (out <= 1.0)))
    assert bool(jnp.allclose(out, _reference(params, x), atol=1e-5, rtol=1e-5))

    # --- stacked evaluations amortized into ONE call (grid > 1, non-multiple B) ---
    key, k2 = jax.random.split(key)
    x_stack = jax.random.normal(k2, (37, in_features), jnp.float32)
    fwd_stack = jax.jit(functools.partial(net_forward, tile_b=8, **static))
    out_stack = jax.block_until_ready(fwd_stack(prep["w_slab"], prep["b_slab"], x_stack))
    assert out_stack.shape == (37, layer_sizes[-1]), out_stack.shape
    assert bool(jnp.allclose(out_stack, _reference(params, x_stack), atol=1e-5, rtol=1e-5))

    print("KERNEL_OK")
</pallas_src>

<mosaic_0001>
module attributes {stable_mosaic.version = 11 : i64} {
  func.func @_fused_mlp_kernel(%arg0: i32, %arg1: memref<8x128xf32, #tpu.memory_space<vmem>>, %arg2: memref<128x384xf32, #tpu.memory_space<vmem>>, %arg3: memref<1x384xf32, #tpu.memory_space<vmem>>, %arg4: memref<8x128xf32, #tpu.memory_space<vmem>>) attributes {dimension_semantics = [#tpu.dimension_semantics<parallel>], iteration_bounds = array<i64: 1>, scalar_prefetch = 0 : i64, scratch_operands = 0 : i64, tpu.core_type = #tpu.core_type<tc>, window_params = [{transform_indices = @transform_0, window_bounds = array<i64: 8, 128>}, {pipeline_mode = #tpu.pipeline_mode<synchronous>, transform_indices = @transform_1, window_bounds = array<i64: 128, 384>}, {pipeline_mode = #tpu.pipeline_mode<synchronous>, transform_indices = @transform_2, window_bounds = array<i64: 1, 384>}, {transform_indices = @transform_3, window_bounds = array<i64: 8, 128>}]} {
    %c0 = arith.constant 0 : index
    %c0_0 = arith.constant 0 : index
    %0 = vector.load %arg1[%c0, %c0_0] : memref<8x128xf32, #tpu.memory_space<vmem>>, vector<8x128xf32>
    %c0_1 = arith.constant 0 : index
    %c0_2 = arith.constant 0 : index
    %1 = vector.load %arg2[%c0_1, %c0_2] : memref<128x384xf32, #tpu.memory_space<vmem>>, vector<128x128xf32>
    %c0_3 = arith.constant 0 : index
    %c0_4 = arith.constant 0 : index
    %2 = vector.load %arg3[%c0_3, %c0_4] : memref<1x384xf32, #tpu.memory_space<vmem>>, vector<1x128xf32>
    %cst = arith.constant dense<0.000000e+00> : vector<8x128xf32>
    %3 = tpu.matmul %0, %1, %cst {dimension_numbers = #tpu.dot_dimension_numbers<[1], [0], [0], [1], [0, 0, 1, 1], [], []>} : vector<8x128xf32>, vector<128x128xf32>, vector<8x128xf32> -> vector<8x128xf32>
    %4 = vector.broadcast %2 : vector<1x128xf32> to vector<8x128xf32>
    %5 = arith.addf %3, %4 : vector<8x128xf32>
    %cst_5 = arith.constant 0.000000e+00 : f32
    %6 = vector.broadcast %cst_5 : f32 to vector<8x128xf32>
    %7 = arith.maximumf %5, %6 : vector<8x128xf32>
    %c0_6 = arith.constant 0 : index
    %c128 = arith.constant 128 : index
    %8 = vector.load %arg2[%c0_6, %c128] : memref<128x384xf32, #tpu.memory_space<vmem>>, vector<128x128xf32>
    %c0_7 = arith.constant 0 : index
    %c128_8 = arith.constant 128 : index
    %9 = vector.load %arg3[%c0_7, %c128_8] : memref<1x384xf32, #tpu.memory_space<vmem>>, vector<1x128xf32>
    %cst_9 = arith.constant dense<0.000000e+00> : vector<8x128xf32>
    %10 = tpu.matmul %7, %8, %cst_9 {dimension_numbers = #tpu.dot_dimension_numbers<[1], [0], [0], [1], [0, 0, 1, 1], [], []>} : vector<8x128xf32>, vector<128x128xf32>, vector<8x128xf32> -> vector<8x128xf32>
    %11 = vector.broadcast %9 : vector<1x128xf32> to vector<8x128xf32>
    %12 = arith.addf %10, %11 : vector<8x128xf32>
    %cst_10 = arith.constant 0.000000e+00 : f32
    %13 = vector.broadcast %cst_10 : f32 to vector<8x128xf32>
    %14 = arith.maximumf %12, %13 : vector<8x128xf32>
    %c0_11 = arith.constant 0 : index
    %c256 = arith.constant 256 : index
    %15 = vector.load %arg2[%c0_11, %c256] : memref<128x384xf32, #tpu.memory_space<vmem>>, vector<128x128xf32>
    %c0_12 = arith.constant 0 : index
    %c256_13 = arith.constant 256 : index
    %16 = vector.load %arg3[%c0_12, %c256_13] : memref<1x384xf32, #tpu.memory_space<vmem>>, vector<1x128xf32>
    %cst_14 = arith.constant dense<0.000000e+00> : vector<8x128xf32>
    %17 = tpu.matmul %14, %15, %cst_14 {dimension_numbers = #tpu.dot_dimension_numbers<[1], [0], [0], [1], [0, 0, 1, 1], [], []>} : vector<8x128xf32>, vector<128x128xf32>, vector<8x128xf32> -> vector<8x128xf32>
    %18 = vector.broadcast %16 : vector<1x128xf32> to vector<8x128xf32>
    %19 = arith.addf %17, %18 : vector<8x128xf32>
    %20 = arith.negf %19 : vector<8x128xf32>
    %21 = math.exp %20 : vector<8x128xf32>
    %cst_15 = arith.constant 1.000000e+00 : f32
    %22 = vector.broadcast %cst_15 : f32 to vector<8x128xf32>
    %23 = arith.addf %22, %21 : vector<8x128xf32>
    %24 = arith.divf %22, %23 : vector<8x128xf32>
    %c0_16 = arith.constant 0 : index
    %c0_17 = arith.constant 0 : index
    %25 = vector.load %arg4[%c0_16, %c0_17] : memref<8x128xf32, #tpu.memory_space<vmem>>, vector<8x128xf32>
    tpu.vector_store %arg4[%c0_16, %c0_17], %24 {strides = array<i32>} : memref<8x128xf32, #tpu.memory_space<vmem>>, vector<8x128xf32>,
    return
  }
  func.func @transform_0(%arg0: i32) -> (i32, i32) {
    %c0_i32 = arith.constant 0 : i32
    %c0_i32_0 = arith.constant 0 : i32
    return %arg0, %c0_i32 : i32, i32
  }
  func.func @transform_1(%arg0: i32) -> (i32, i32) {
    %c0_i32 = arith.constant 0 : i32
    %c0_i32_0 = arith.constant 0 : i32
    %c0_i32_1 = arith.constant 0 : i32
    return %c0_i32, %c0_i32_0 : i32, i32
  }
  func.func @transform_2(%arg0: i32) -> (i32, i32) {
    %c0_i32 = arith.constant 0 : i32
    %c0_i32_0 = arith.constant 0 : i32
    %c0_i32_1 = arith.constant 0 : i32
    return %c0_i32, %c0_i32_0 : i32, i32
  }
  func.func @transform_3(%arg0: i32) -> (i32, i32) {
    %c0_i32 = arith.constant 0 : i32
    %c0_i32_0 = arith.constant 0 : i32
    return %arg0, %c0_i32 : i32, i32
  }
}

</mosaic_0001>

<bundles_post_ra>
// kernel: net_forward.1
= control target key start
LH: loop header
LB: loop body
LE: loop exit
PB: predicated region body
PF: predicated region fallthrough
CT: control target
= control target key end

     0   :  { %8 = vsyncpa [#allocation3], 0  ;;  %s215_s15 = smov [#allocation2]   ;;  %s216_s17 = smov 384   ;;  %s256_s0 = inlined_call_operand.vmem [shape: f32[8,128], index: 0, kind: input, shape index: {}]   ;;  %s257_s1 = inlined_call_operand.hbm [shape: f32[128,384], index: 1, kind: input, shape index: {}]   ;;  %s258_s2 = inlined_call_operand.vmem [shape: f32[1,384], index: 2, kind: input, shape index: {}]   ;;  %s259_s3 = inlined_call_operand.vmem [shape: f32[8,128], index: 3, kind: output, shape index: {}]  }
   0x1   :  { %s15_s14 = sshll.u32 %s257_s1, 4  ;;  %s17_s16 = sshll.u32 %s215_s15, 4  ;;  %s16_s14 = int_to_ptr.hbm [resolvable:$true] %s15_s14  ;;  %s18_s16 = int_to_ptr.vmem [resolvable:$true] %s17_s16 }
   0x2   :  { %s217_s18 = smov 24  }
   0x3   :  { %23 = dma.hbm_to_vmem [thread:$0]  %s16_s14, 6144, %s18_s16, [#allocation3], %s216_s17, %s216_s17, %s217_s18  }
   0x4   :  { %213 = dma.done.wait [#allocation3], 6144  }
   0x5   :  { %214 = vsyncadd [#allocation3], 4294961152  ;;  %v46_v0 = vld [vmem:[#allocation2 + $0x168] sm:$0xff]  ;;  %v45_v1 = vld [vmem:[#allocation2 + $0x150] sm:$0xff] }
   0x6   :  { %51 = vmatpush.msra.mxu0 %v46_v0  ;;  %v44_v2 = vld [vmem:[#allocation2 + $0x138] sm:$0xff]  ;;  %v43_v3 = vld [vmem:[#allocation2 + $0x120] sm:$0xff]  ;;  %v87_v4 = vld [vmem:[#allocation2 + $0x170] sm:$0xff] }
   0x7   :  { %v42_v5 = vld [vmem:[#allocation2 + $0x108] sm:$0xff]  ;;  %92 = vmatpush.msra.mxu1 %v87_v4  ;;  %v86_v6 = vld [vmem:[#allocation2 + $0x158] sm:$0xff]  ;;  %v85_v7 = vld [vmem:[#allocation2 + $0x140] sm:$0xff] }
   0x8   :  { %52 = vmatpush.msra.mxu0 %v45_v1  ;;  %v41_v8 = vld [vmem:[#allocation2 + $0xf0] sm:$0xff]  ;;  %v84_v9 = vld [vmem:[#allocation2 + $0x128] sm:$0xff]  ;;  %v40_v10 = vld [vmem:[#allocation2 + $0xd8] sm:$0xff] }
   0x9   :  { %93 = vmatpush.msra.mxu1 %v86_v6  ;;  %v83_v11 = vld [vmem:[#allocation2 + $0x110] sm:$0xff]  ;;  %v39_v12 = vld [vmem:[#allocation2 + $0xc0] sm:$0xff]  ;;  %v82_v13 = vld [vmem:[#allocation2 + $0xf8] sm:$0xff] }
   0xa   :  { %53 = vmatpush.msra.mxu0 %v44_v2  ;;  %v38_v14 = vld [vmem:[#allocation2 + $0xa8] sm:$0xff]  ;;  %v81_v15 = vld [vmem:[#allocation2 + $0xe0] sm:$0xff]  ;;  %v37_v16 = vld [vmem:[#allocation2 + $0x90] sm:$0xff] }
   0xb   :  { %94 = vmatpush.msra.mxu1 %v85_v7  ;;  %v80_v17 = vld [vmem:[#allocation2 + $0xc8] sm:$0xff]  ;;  %v36_v18 = vld [vmem:[#allocation2 + $0x78] sm:$0xff]  ;;  %v79_v19 = vld [vmem:[#allocation2 + $0xb0] sm:$0xff] }
   0xc   :  { %54 = vmatpush.msra.mxu0 %v43_v3  ;;  %v35_v20 = vld [vmem:[#allocation2 + $0x60] sm:$0xff]  ;;  %v78_v21 = vld [vmem:[#allocation2 + $0x98] sm:$0xff]  ;;  %v34_v22 = vld [vmem:[#allocation2 + $0x48] sm:$0xff] }
   0xd   :  { %95 = vmatpush.msra.mxu1 %v84_v9  ;;  %v77_v23 = vld [vmem:[#allocation2 + $0x80] sm:$0xff]  ;;  %v33_v24 = vld [vmem:[#allocation2 + $0x30] sm:$0xff]  ;;  %v76_v25 = vld [vmem:[#allocation2 + $0x68] sm:$0xff] }
   0xe   :  { %55 = vmatpush.msra.mxu0 %v42_v5  ;;  %v32_v26 = vld [vmem:[#allocation2 + $0x18] sm:$0xff]  ;;  %v75_v27 = vld [vmem:[#allocation2 + $0x50] sm:$0xff]  ;;  %v31_v28 = vld [vmem:[#allocation2] sm:$0xff] }
   0xf   :  { %96 = vmatpush.msra.mxu1 %v83_v11  ;;  %v30_v29 = vld [vmem:[%s256_s0] sm:$0xff]  ;;  %v74_v30 = vld [vmem:[#allocation2 + $0x38] sm:$0xff]  ;;  %v72_v32 = vld [vmem:[#allocation2 + $0x8] sm:$0xff] }
  0x10   :  { %56 = vmatpush.msra.mxu0 %v41_v8  ;;  %v73_v31 = vld [vmem:[#allocation2 + $0x20] sm:$0xff]  ;;  %v128_v33 = vld [vmem:[#allocation2 + $0x178] sm:$0xff]  ;;  %v126_v35 = vld [vmem:[#allocation2 + $0x148] sm:$0xff] }
  0x11   :  { %97 = vmatpush.msra.mxu1 %v82_v13  ;;  %v127_v34 = vld [vmem:[#allocation2 + $0x160] sm:$0xff]  ;;  %133 = vmatpush.msra.mxu2 %v128_v33  ;;  %v125_v36 = vld [vmem:[#allocation2 + $0x130] sm:$0xff]  ;;  %v124_v37 = vld [vmem:[#allocation2 + $0x118] sm:$0xff] }
  0x12   :  { %57 = vmatpush.msra.mxu0 %v40_v10  ;;  %v123_v38 = vld [vmem:[#allocation2 + $0x100] sm:$0xff]  ;;  %v122_v39 = vld [vmem:[#allocation2 + $0xe8] sm:$0xff]  ;;  %v121_v40 = vld [vmem:[#allocation2 + $0xd0] sm:$0xff] }
  0x13   :  { %98 = vmatpush.msra.mxu1 %v81_v15  ;;  %134 = vmatpush.msra.mxu2 %v127_v34  ;;  %v120_v41 = vld [vmem:[#allocation2 + $0xb8] sm:$0xff]  ;;  %v119_v42 = vld [vmem:[#allocation2 + $0xa0] sm:$0xff]  ;;  %v118_v43 = vld [vmem:[#allocation2 + $0x88] sm:$0xff] }
  0x14   :  { %58 = vmatpush.msra.mxu0 %v39_v12  ;;  %v117_v44 = vld [vmem:[#allocation2 + $0x70] sm:$0xff]  ;;  %v116_v45 = vld [vmem:[#allocation2 + $0x58] sm:$0xff]  ;;  %v182_v46 = vld [vmem:[%s258_s2] ss:$0 sm:$0xff] }
  0x15   :  { %99 = vmatpush.msra.mxu1 %v80_v17  ;;  %135 = vmatpush.msra.mxu2 %v126_v35  ;;  %v115_v50 = vld [vmem:[#allocation2 + $0x40] sm:$0xff]  ;;  %v114_v51 = vld [vmem:[#allocation2 + $0x28] sm:$0xff]  ;;  %v113_v52 = vld [vmem:[#allocation2 + $0x10] sm:$0xff] }
  0x16   :  { %59 = vmatpush.msra.mxu0 %v38_v14  ;;  %v183_v53 = vld [vmem:[%s258_s2 + $0x1] ss:$0 sm:$0xff]  ;;  %v184_v57 = vld [vmem:[%s258_s2 + $0x2] ss:$0 sm:$0xff] }
  0x17   :  { %100 = vmatpush.msra.mxu1 %v79_v19  ;;  %136 = vmatpush.msra.mxu2 %v125_v36 }
  0x18   :  { %60 = vmatpush.msra.mxu0 %v37_v16 }
  0x19   :  { %101 = vmatpush.msra.mxu1 %v78_v21  ;;  %137 = vmatpush.msra.mxu2 %v124_v37 }
  0x1a   :  { %61 = vmatpush.msra.mxu0 %v36_v18 }
  0x1b   :  { %102 = vmatpush.msra.mxu1 %v77_v23  ;;  %138 = vmatpush.msra.mxu2 %v123_v38 }
  0x1c   :  { %62 = vmatpush.msra.mxu0 %v35_v20 }
  0x1d   :  { %103 = vmatpush.msra.mxu1 %v76_v25  ;;  %139 = vmatpush.msra.mxu2 %v122_v39 }
  0x1e   :  { %63 = vmatpush.msra.mxu0 %v34_v22 }
  0x1f   :  { %104 = vmatpush.msra.mxu1 %v75_v27  ;;  %140 = vmatpush.msra.mxu2 %v121_v40 }
  0x20   :  { %64 = vmatpush.msra.mxu0 %v33_v24 }
  0x21   :  { %105 = vmatpush.msra.mxu1 %v74_v30  ;;  %141 = vmatpush.msra.mxu2 %v120_v41 }
  0x22   :  { %65 = vmatpush.msra.mxu0 %v32_v26 }
  0x23   :  { %106 = vmatpush.msra.mxu1 %v73_v31  ;;  %142 = vmatpush.msra.mxu2 %v119_v42 }
  0x24   :  { %66 = vmatpush.msra.mxu0 %v31_v28 }
  0x25   :  { %67 = vmatmul.f32.vlgmr.msra.gmra.mxu0 %v30_v29  ;;  %107 = vmatpush.msra.mxu1 %v72_v32 }
  0x26   :  { %143 = vmatpush.msra.mxu2 %v118_v43 }
  0x28   :  { %144 = vmatpush.msra.mxu2 %v117_v44 }
  0x2a   :  { %145 = vmatpush.msra.mxu2 %v116_v45 }
  0x2c   :  { %146 = vmatpush.msra.mxu2 %v115_v50 }
  0x2e   :  { %147 = vmatpush.msra.mxu2 %v114_v51 }
  0x30   :  { %148 = vmatpush.msra.mxu2 %v113_v52 }
  0xa2   :  { %v68_v47 = vpop.f32.mrf.mxu0 }
  0xa3   :  { %v69_v48 = vadd.f32 %v182_v46, %v68_v47 }
  0xa5   :  { %v71_v49 = vmax.f32 %v69_v48, 0.0 }
  0xa7   :  { %108 = vmatmul.f32.vlgmr.msra.gmra.mxu1 %v71_v49 }
 0x124   :  { %v109_v54 = vpop.f32.mrf.mxu1 }
 0x125   :  { %v110_v55 = vadd.f32 %v183_v53, %v109_v54 }
 0x127   :  { %v112_v56 = vmax.f32 %v110_v55, 0.0 }
 0x129   :  { %149 = vmatmul.f32.vlgmr.msra.gmra.mxu2 %v112_v56 }
 0x1ac   :  { %v150_v58 = vpop.f32.mrf.mxu2 }
 0x1ad   :  { %v151_v59 = vadd.f32 %v184_v57, %v150_v58 }
 0x1af   :  { %v178_v60 = vmul.f32 -1.442695, %v151_v59 }
 0x1b1   :  { %185 = vpow2.f32 %v178_v60 }
 0x1b7   :  { %v186_v61 = vpop.eup %185 }
 0x1b8   :  { %v156_v62 = vadd.f32 1.0, %v186_v61 }
 0x1ba   :  { %187 = vrcp.f32 %v156_v62  ;;  %v168_v2 = vand.u32 2147483648, %v156_v62  ;;  %v166_v4 = vand.u32 2147483647, %v156_v62  ;;  %vm162_vm1 = vweird.f32 %v156_v62 }
 0x1bc   :  { %v169_v6 = vor.u32 1.1754944e-38, %v168_v2  ;;  %vm167_vm3 = vcmp.eq.f32.partialorder %v166_v4, 8.507059e+37 }
 0x1c0   :  { %v188_v63 = vpop.eup %187 }
 0x1c1   :  { %v158_v0 = vmul.f32 %v188_v63, %v156_v62  ;;  %vm163_vm0 = vweird.f32 %v188_v63 }
 0x1c2   :  { %vm164_vm2 = vmor %vm162_vm1, %vm163_vm0 }
 0x1c3   :  { %v159_v1 = vsub.f32 1.0, %v158_v0 }
 0x1c5   :  { %v160_v3 = vmul.f32 %v188_v63, %v159_v1 }
 0x1c7   :  { %v161_v5 = vadd.f32 %v188_v63, %v160_v3 }
 0x1c9   :  { %v165_v7 = vsel %vm164_vm2, %v188_v63, %v161_v5 }
 0x1ca   :  { %v170_v8 = vsel %vm167_vm3, %v169_v6, %v165_v7 }
 0x1cb   :  { %172 = vst [vmem:[%s259_s3] sm:$0xff] %v170_v8 }
 0x1cc   :  { %177 = vsyncpa [#allocation3], 1 }

</bundles_post_ra>
